<compile_context>
chip_gen: v6e
topology: v6e:2x2x1
jax: 0.10.0
libtpu: 0.0.40
codegen_flags: <defaults>
</compile_context>

<pallas_src>
import jax
import jax.numpy as jnp
from jax.experimental import pallas as pl
from jax.experimental.pallas import tpu as pltpu

EPS = 1e-5  # nn.LayerNorm default


def _prenorm_linear_kernel(x_ref, gamma_ref, beta_ref, w_ref, b_ref, o_ref, xn_ref):
    # x_ref:     [TM, D]   row tile of flattened (batch*tokens, dim); resident across inner axis
    # gamma_ref: [1, D]    LayerNorm weight (resident across the whole grid)
    # beta_ref:  [1, D]    LayerNorm bias   (resident across the whole grid)
    # w_ref:     [D, TH]   Linear weight column tile
    # b_ref:     [1, TH]   Linear bias column tile
    # o_ref:     [TM, TH]  output tile
    # xn_ref:    [TM, D]   VMEM scratch holding LayerNorm(x) for the current row tile
    j = pl.program_id(1)

    @pl.when(j == 0)
    def _():
        # LayerNorm statistics in f32 (biased variance, like nn.LayerNorm),
        # computed once per row tile and cached for all H tiles.
        x = x_ref[...].astype(jnp.float32)
        mean = jnp.mean(x, axis=-1, keepdims=True)
        xc = x - mean
        var = jnp.mean(xc * xc, axis=-1, keepdims=True)
        inv = jax.lax.rsqrt(var + EPS)
        xn = (xc * inv) * gamma_ref[...].astype(jnp.float32) \
            + beta_ref[...].astype(jnp.float32)
        xn_ref[...] = xn.astype(xn_ref.dtype)

    # MXU matmul with input-dtype operands (bf16 when x is bf16) and f32 accumulation.
    y = jnp.dot(xn_ref[...], w_ref[...].astype(xn_ref.dtype),
                preferred_element_type=jnp.float32)
    y = y + b_ref[...].astype(jnp.float32)
    o_ref[...] = y.astype(o_ref.dtype)


def _round_up(a, m):
    return (a + m - 1) // m * m


def prenorm_linear(x, gamma, beta, w, b, *, tm=512, th=512):
    """x: [B, N, D]; returns fn(LayerNorm(x)) with fn = x @ w + b, shape [B, N, H]."""
    B, N, D = x.shape
    H = w.shape[1]
    M = B * N
    x2 = x.reshape(M, D)

    # Row tile: multiple of 8 sublanes; pad M up to a multiple of TM.
    TM = tm if M >= tm else _round_up(M, 8)
    M_pad = _round_up(M, TM)

    # Column tile: lane-dense (multiple of 128); pad H up to a multiple of 128.
    H_pad = _round_up(H, 128)
    TH = 128
    for cand in (th, 1024, 512, 256, 128):
        if cand <= H_pad and H_pad % cand == 0:
            TH = cand
            break

    if M_pad != M:
        x2 = jnp.pad(x2, ((0, M_pad - M), (0, 0)))
    w2 = w
    b2 = b.reshape(1, H)
    if H_pad != H:
        w2 = jnp.pad(w2, ((0, 0), (0, H_pad - H)))
        b2 = jnp.pad(b2, ((0, 0), (0, H_pad - H)))

    n_m = M_pad // TM
    n_h = H_pad // TH

    itemsize = jnp.dtype(x.dtype).itemsize
    cost = pl.CostEstimate(
        flops=2 * M_pad * D * H_pad,
        transcendentals=M_pad,  # one rsqrt per row (LN computed once per row tile)
        bytes_accessed=(M_pad * D * itemsize                              # x read once
                        + n_m * D * H_pad * jnp.dtype(w2.dtype).itemsize  # weight per row tile
                        + M_pad * H_pad * itemsize),                      # output
    )

    out = pl.pallas_call(
        _prenorm_linear_kernel,
        out_shape=jax.ShapeDtypeStruct((M_pad, H_pad), x.dtype),
        grid_spec=pltpu.PrefetchScalarGridSpec(
            num_scalar_prefetch=0,
            # M axis OUTER, H axis INNER: the x block index depends only on i,
            # so each row tile is fetched once and its LayerNorm is cached in
            # the VMEM scratch across all H tiles.
            grid=(n_m, n_h),
            in_specs=[
                pl.BlockSpec((TM, D), lambda i, j: (i, 0)),   # x rows (resident over j)
                pl.BlockSpec((1, D), lambda i, j: (0, 0)),    # gamma
                pl.BlockSpec((1, D), lambda i, j: (0, 0)),    # beta
                pl.BlockSpec((D, TH), lambda i, j: (0, j)),   # weight columns
                pl.BlockSpec((1, TH), lambda i, j: (0, j)),   # bias columns
            ],
            out_specs=pl.BlockSpec((TM, TH), lambda i, j: (i, j)),
            scratch_shapes=[pltpu.VMEM((TM, D), x.dtype)],    # cached LayerNorm(x)
        ),
        compiler_params=pltpu.CompilerParams(
            # Inner H axis carries the scratch dependency -> "arbitrary";
            # outer M axis is independent -> "parallel" (megacore sharding).
            dimension_semantics=("parallel", "arbitrary"),
            vmem_limit_bytes=48 * 1024 * 1024,
        ),
        cost_estimate=cost,
    )(x2, gamma.reshape(1, D), beta.reshape(1, D), w2, b2)

    return out[:M, :H].reshape(B, N, H)


def _reference(x, gamma, beta, w, b):
    mean = jnp.mean(x, axis=-1, keepdims=True)
    var = jnp.mean((x - mean) ** 2, axis=-1, keepdims=True)
    xn = (x - mean) / jnp.sqrt(var + EPS) * gamma + beta
    return jnp.einsum("bnd,dh->bnh", xn, w) + b


if __name__ == "__main__":
    key = jax.random.PRNGKey(0)

    # Small but lane-realistic shapes; N and H chosen to also exercise the
    # row/column padding paths and a multi-tile grid with explicit small tiles.
    B, N, D, H = 2, 61, 128, 192  # tokens=61 -> M=122 (row pad), H=192 (col pad)

    kx, kg, kb, kw, kbias = jax.random.split(key, 5)
    x = jax.random.normal(kx, (B, N, D), dtype=jnp.float32)
    gamma = 1.0 + 0.1 * jax.random.normal(kg, (D,), dtype=jnp.float32)
    beta = 0.1 * jax.random.normal(kb, (D,), dtype=jnp.float32)
    w = jax.random.normal(kw, (D, H), dtype=jnp.float32) / jnp.sqrt(D)
    bias = 0.1 * jax.random.normal(kbias, (H,), dtype=jnp.float32)

    ref = _reference(x, gamma, beta, w, bias)

    # 1) Small tiles -> 2x2 grid, padding on both M and H, exercises the
    #    scratch-caching path across the inner H axis.
    out_small = prenorm_linear(x, gamma, beta, w, bias, tm=64, th=128)
    out_small = jax.block_until_ready(out_small)
    assert out_small.shape == (B, N, H)
    assert jnp.allclose(out_small, ref, atol=1e-3, rtol=1e-3), "mismatch (tiled)"

    # 2) Default production tile sizes (single block here, same code path).
    out_def = prenorm_linear(x, gamma, beta, w, bias)
    out_def = jax.block_until_ready(out_def)
    assert jnp.allclose(out_def, ref, atol=1e-3, rtol=1e-3), "mismatch (default tiles)"

    # TODO(synk): PreNorm wraps an arbitrary `fn`; here fn is materialized as the
    # canonical Linear(dim->hidden) projection (first op of ViT FeedForward/Attention).
    print("KERNEL_OK")
</pallas_src>

<mosaic_0001>
module attributes {stable_mosaic.version = 11 : i64} {
  func.func @_prenorm_linear_kernel(%arg0: i32, %arg1: i32, %arg2: memref<64x128xf32, #tpu.memory_space<vmem>>, %arg3: memref<1x128xf32, #tpu.memory_space<vmem>>, %arg4: memref<1x128xf32, #tpu.memory_space<vmem>>, %arg5: memref<128x128xf32, #tpu.memory_space<vmem>>, %arg6: memref<1x128xf32, #tpu.memory_space<vmem>>, %arg7: memref<64x128xf32, #tpu.memory_space<vmem>>, %arg8: memref<64x128xf32, #tpu.memory_space<vmem>>) attributes {dimension_semantics = [#tpu.dimension_semantics<parallel>, #tpu.dimension_semantics<arbitrary>], iteration_bounds = array<i64: 2, 2>, scalar_prefetch = 0 : i64, scratch_operands = 1 : i64, tpu.core_type = #tpu.core_type<tc>, window_params = [{transform_indices = @transform_0, window_bounds = array<i64: 64, 128>}, {pipeline_mode = #tpu.pipeline_mode<synchronous>, transform_indices = @transform_1, window_bounds = array<i64: 1, 128>}, {pipeline_mode = #tpu.pipeline_mode<synchronous>, transform_indices = @transform_2, window_bounds = array<i64: 1, 128>}, {transform_indices = @transform_3, window_bounds = array<i64: 128, 128>}, {transform_indices = @transform_4, window_bounds = array<i64: 1, 128>}, {transform_indices = @transform_5, window_bounds = array<i64: 64, 128>}]} {
    %c0_i32 = arith.constant 0 : i32
    %0 = arith.cmpi eq, %arg1, %c0_i32 : i32
    %1 = arith.extui %0 : i1 to i32
    %c0_i32_0 = arith.constant 0 : i32
    %2 = arith.cmpi ne, %1, %c0_i32_0 : i32
    scf.if %2 {
      %c0_8 = arith.constant 0 : index
      %c0_9 = arith.constant 0 : index
      %10 = vector.load %arg2[%c0_8, %c0_9] : memref<64x128xf32, #tpu.memory_space<vmem>>, vector<64x128xf32>
      %cst_10 = arith.constant dense<0.000000e+00> : vector<64xf32>
      %11 = vector.multi_reduction <add>, %10, %cst_10 [1] : vector<64x128xf32> to vector<64xf32>
      %12 = vector.shape_cast %11 : vector<64xf32> to vector<64x1xf32>
      %cst_11 = arith.constant 1.280000e+02 : f32
      %13 = vector.broadcast %cst_11 : f32 to vector<64x1xf32>
      %14 = arith.divf %12, %13 : vector<64x1xf32>
      %15 = vector.broadcast %14 : vector<64x1xf32> to vector<64x128xf32>
      %16 = arith.subf %10, %15 : vector<64x128xf32>
      %17 = arith.mulf %16, %16 : vector<64x128xf32>
      %cst_12 = arith.constant dense<0.000000e+00> : vector<64xf32>
      %18 = vector.multi_reduction <add>, %17, %cst_12 [1] : vector<64x128xf32> to vector<64xf32>
      %19 = vector.shape_cast %18 : vector<64xf32> to vector<64x1xf32>
      %cst_13 = arith.constant 1.280000e+02 : f32
      %20 = vector.broadcast %cst_13 : f32 to vector<64x1xf32>
      %21 = arith.divf %19, %20 : vector<64x1xf32>
      %cst_14 = arith.constant 9.99999974E-6 : f32
      %22 = vector.broadcast %cst_14 : f32 to vector<64x1xf32>
      %23 = arith.addf %21, %22 : vector<64x1xf32>
      %24 = math.rsqrt %23 : vector<64x1xf32>
      %25 = vector.broadcast %24 : vector<64x1xf32> to vector<64x128xf32>
      %26 = arith.mulf %16, %25 : vector<64x128xf32>
      %c0_15 = arith.constant 0 : index
      %c0_16 = arith.constant 0 : index
      %27 = vector.load %arg3[%c0_15, %c0_16] : memref<1x128xf32, #tpu.memory_space<vmem>>, vector<1x128xf32>
      %28 = vector.broadcast %27 : vector<1x128xf32> to vector<64x128xf32>
      %29 = arith.mulf %26, %28 : vector<64x128xf32>
      %c0_17 = arith.constant 0 : index
      %c0_18 = arith.constant 0 : index
      %30 = vector.load %arg4[%c0_17, %c0_18] : memref<1x128xf32, #tpu.memory_space<vmem>>, vector<1x128xf32>
      %31 = vector.broadcast %30 : vector<1x128xf32> to vector<64x128xf32>
      %32 = arith.addf %29, %31 : vector<64x128xf32>
      %c0_19 = arith.constant 0 : index
      %c0_20 = arith.constant 0 : index
      %33 = vector.load %arg8[%c0_19, %c0_20] : memref<64x128xf32, #tpu.memory_space<vmem>>, vector<64x128xf32>
      tpu.vector_store %arg8[%c0_19, %c0_20], %32 {strides = array<i32>} : memref<64x128xf32, #tpu.memory_space<vmem>>, vector<64x128xf32>,
    } else {
    }
    %c0 = arith.constant 0 : index
    %c0_1 = arith.constant 0 : index
    %3 = vector.load %arg8[%c0, %c0_1] : memref<64x128xf32, #tpu.memory_space<vmem>>, vector<64x128xf32>
    %c0_2 = arith.constant 0 : index
    %c0_3 = arith.constant 0 : index
    %4 = vector.load %arg5[%c0_2, %c0_3] : memref<128x128xf32, #tpu.memory_space<vmem>>, vector<128x128xf32>
    %cst = arith.constant dense<0.000000e+00> : vector<64x128xf32>
    %5 = tpu.matmul %3, %4, %cst {dimension_numbers = #tpu.dot_dimension_numbers<[1], [0], [0], [1], [0, 0, 1, 1], [], []>} : vector<64x128xf32>, vector<128x128xf32>, vector<64x128xf32> -> vector<64x128xf32>
    %c0_4 = arith.constant 0 : index
    %c0_5 = arith.constant 0 : index
    %6 = vector.load %arg6[%c0_4, %c0_5] : memref<1x128xf32, #tpu.memory_space<vmem>>, vector<1x128xf32>
    %7 = vector.broadcast %6 : vector<1x128xf32> to vector<64x128xf32>
    %8 = arith.addf %5, %7 : vector<64x128xf32>
    %c0_6 = arith.constant 0 : index
    %c0_7 = arith.constant 0 : index
    %9 = vector.load %arg7[%c0_6, %c0_7] : memref<64x128xf32, #tpu.memory_space<vmem>>, vector<64x128xf32>
    tpu.vector_store %arg7[%c0_6, %c0_7], %8 {strides = array<i32>} : memref<64x128xf32, #tpu.memory_space<vmem>>, vector<64x128xf32>,
    return
  }
  func.func @transform_0(%arg0: i32, %arg1: i32) -> (i32, i32) {
    %c0_i32 = arith.constant 0 : i32
    %c0_i32_0 = arith.constant 0 : i32
    return %arg0, %c0_i32 : i32, i32
  }
  func.func @transform_1(%arg0: i32, %arg1: i32) -> (i32, i32) {
    %c0_i32 = arith.constant 0 : i32
    %c0_i32_0 = arith.constant 0 : i32
    %c0_i32_1 = arith.constant 0 : i32
    return %c0_i32, %c0_i32_0 : i32, i32
  }
  func.func @transform_2(%arg0: i32, %arg1: i32) -> (i32, i32) {
    %c0_i32 = arith.constant 0 : i32
    %c0_i32_0 = arith.constant 0 : i32
    %c0_i32_1 = arith.constant 0 : i32
    return %c0_i32, %c0_i32_0 : i32, i32
  }
  func.func @transform_3(%arg0: i32, %arg1: i32) -> (i32, i32) {
    %c0_i32 = arith.constant 0 : i32
    %c0_i32_0 = arith.constant 0 : i32
    return %c0_i32, %arg1 : i32, i32
  }
  func.func @transform_4(%arg0: i32, %arg1: i32) -> (i32, i32) {
    %c0_i32 = arith.constant 0 : i32
    %c0_i32_0 = arith.constant 0 : i32
    return %c0_i32, %arg1 : i32, i32
  }
  func.func @transform_5(%arg0: i32, %arg1: i32) -> (i32, i32) {
    %c0_i32 = arith.constant 0 : i32
    return %arg0, %arg1 : i32, i32
  }
}

</mosaic_0001>

<bundles_post_ra>
// kernel: tpu_custom_call.1
= control target key start
LH: loop header
LB: loop body
LE: loop exit
PB: predicated region body
PF: predicated region fallthrough
CT: control target
= control target key end

     0   :  { %s1740_s0 = inlined_call_operand.hbm [shape: f32[128,128], index: 0, kind: input, shape index: {}]   ;;  %s1741_s1 = inlined_call_operand.vmem [shape: f32[1,128], index: 1, kind: input, shape index: {}]   ;;  %s1742_s2 = inlined_call_operand.hbm [shape: f32[1,128], index: 2, kind: input, shape index: {}]   ;;  %s1743_s3 = inlined_call_operand.hbm [shape: f32[128,256], index: 3, kind: input, shape index: {}]   ;;  %s1744_s4 = inlined_call_operand.vmem [shape: f32[1,256], index: 4, kind: input, shape index: {}]   ;;  %s1745_s5 = inlined_call_operand.hbm [shape: f32[128,256], index: 5, kind: output, shape index: {}]  }
   0x1   :  { %1758 = sst [smem:[#allocation21_spill]] %s1740_s0 }
   0x2   :  { %1759 = sst [smem:[#allocation22_spill]] %s1741_s1 }
   0x3   :  { %1760 = sst [smem:[#allocation23_spill]] %s1742_s2 }
   0x4   :  { %1761 = sst [smem:[#allocation24_spill]] %s1744_s4 }
   0x5   :  { %1762 = sst [smem:[#allocation25_spill]] %s1745_s5 }
   0x6   :  { %10 = vsyncpa [#allocation4], 0 }
   0x7   :  { %12 = vsyncpa [#allocation4 + $0x1], 0 }
   0x8   :  { %13 = vsyncpa [#allocation7], 0 }
   0x9   :  { %14 = vsyncpa [#allocation5], 0 }
   0xa   :  { %16 = vsyncpa [#allocation5 + $0x1], 0  ;;  %s1313_s18 = smov 0   ;;  %s1315_s19 = smov 0  }
   0xb   :  { %s1317_s20 = smov 0   ;;  %s1319_s21 = smov 0  }
   0xc   :  { %s1321_s22 = smov 0   ;;  %s1323_s23 = smov 0  }
   0xd   :  { %s1325_s24 = smov 0   ;;  %s1327_s25 = smov 0  }
   0xe   :  { %s1329_s26 = smov 0   ;;  %s1331_s27 = smov 0  }
   0xf   :  { %s1333_s28 = smov 0   ;;  %s1335_s29 = smov 0  }
  0x10   :  { %s1337_s30 = smov 0   ;;  %s1339_s6 = smov 0  }
  0x11 LB: > { %1763 = sst [smem:[#allocation14_spill]] %s1255_s27  ;;  %s31_s7 = sadd.s32 1, %s1263_s29  ;;  %s1271_s6 = sphi %s1339_s6, %s22_s6   ;;  %s1267_s30 = sphi %s1337_s30, %s1803_s30   ;;  %s1263_s29 = sphi %s1335_s29, %s1802_s29   ;;  %s1259_s28 = sphi %s1333_s28, %s1801_s28   ;;  %s1255_s27 = sphi %s1331_s27, %s1800_s27   ;;  %s1251_s26 = sphi %s1329_s26, %s1812_s26   ;;  %s1247_s25 = sphi %s1327_s25, %s1811_s25   ;;  %s1243_s24 = sphi %s1325_s24, %s1810_s24   ;;  %s1239_s23 = sphi %s1323_s23, %s1809_s23   ;;  %s1235_s22 = sphi %s1321_s22, %s1808_s22   ;;  %s1231_s21 = sphi %s1319_s21, %s1807_s21   ;;  %s1227_s20 = sphi %s1317_s20, %s1806_s20   ;;  %s1223_s19 = sphi %s1315_s19, %s1805_s19   ;;  %s1219_s18 = sphi %s1313_s18, %s1804_s18  }
  0x12   : > { %1764 = sst [smem:[#allocation15_spill]] %s1259_s28  ;;  %s34_s8 = sadd.s32 1, %s1267_s30 }
  0x13   : > { %1765 = sst [smem:[#allocation16_spill]] %s1263_s29  ;;  %p32_p0 = scmp.ge.s32.totalorder %s31_s7, 2 }
  0x14   : > { %1766 = sst [smem:[#allocation17_spill]] %s1267_s30  ;;  %s41_s9 = sadd.s32 1, %s1251_s26 }
  0x15   : > { %p48_p1 = scmp.ne.s32.totalorder %s1251_s26, %s1247_s25  ;;  %p49_p2 = scmp.eq.s32.totalorder %s1271_s6, 0 }
  0x16   : > { %s1814_s7 = smov (%p32_p0, %s31_s7), 0  ;;  %s1816_s8 = smov (!%p32_p0, %s34_s8), %s1267_s30 }
  0x17   : > { %1767 = sst [smem:[#allocation18_spill]] %s1814_s7  ;;  %p1394_p3 = por %p49_p2, %p48_p1 }
  0x18   : > { %s1400_s11 = ssub.s32 %s1263_s29, %s1814_s7  ;;  %p36_p4 = scmp.ge.s32.totalorder %s1816_s8, 2 }
  0x19   : > { %p107_p5 = scmp.eq.s32.totalorder %s1400_s11, 0  ;;  %p1750_p6 = scmp.lt.s32.totalorder %s1271_s6, 4 }
  0x1a   : > { %s1818_s8 = smov (%p36_p4, %s1816_s8), 0  ;;  %s214_s12 = sand.u32 1, %s1271_s6  }
  0x1b   : > { %1769 = sst [smem:[#allocation19_spill]] %s1818_s8  ;;  %s216_s13 = sand.u32 1, %s1251_s26  }
  0x1c   : > { %s38_s14 = ssub.s32 %s1267_s30, %s1818_s8  ;;  %s751_s17 = sshll.u32 %s216_s13, 6 }
  0x1d   : > { %p39_p7 = scmp.eq.s32.totalorder %s38_s14, 0  ;;  %s160_s15 = sor.u32 %s1400_s11, %s38_s14 }
  0x1e   : > { %p1411_p8 = scmp.eq.s32.totalorder %s160_s15, 0  ;;  %s771_s5 = sshll.u32 %s1267_s30, 10 }
  0x1f   : > { %s1416_s7 = scalar_select %p39_p7, %s1251_s26, %s41_s9  }
  0x20   : > { %s1772_s0 = sld [smem:[#allocation21_spill]]  ;;  %s218_s27 = scalar_lea.vmem [#allocation3], %s751_s17 }
  0x21   : > { %1771 = sst [smem:[#allocation20_spill]] %s1416_s7  ;;  %s225_s2 = sshll.u32 %s218_s27, 4  ;;  %s226_s2 = int_to_ptr.vmem [resolvable:$true] %s225_s2 }
  0x22   : > { %p1426_p9 = pnand %p1750_p6, %p1394_p3  ;;  %s1430_s14 = scalar_lea.sflag [#allocation4], %s214_s12 }
  0x23   : > { %s1050_s9 = scalar_lea.vmem %s226_s2, 1024  ;;  %s1273_s1 = smov [#allocation3]  }
  0x24   : > { %p1039_p10 = pneg %p1426_p9  ;;  %p1051_p11 = scmp.ne.s32.totalorder %s226_s2, %s1050_s9 }
  0x26   : > { %s224_s4 = scalar_lea.hbm %s1772_s0, %s771_s5  ;;  %p1053_p12 = pnand %p1051_p11, %p1039_p10 }
  0x27   : > { %s1055_s5 = sshll.u32 %s1273_s1, 4  ;;  %s1056_s5 = int_to_ptr.vmem [resolvable:$false] %s1055_s5 }
  0x28   : > { %p1054_p13 = pneg %p1053_p12  ;;  %s1057_s27 = scalar_lea.vmem %s1056_s5, 2048 }
  0x29   : > { %p1058_p0 = scmp.lt.s32.totalorder %s226_s2, %s1056_s5  ;;  %p1059_p1 = scmp.lt.s32.totalorder %s1057_s27, %s1050_s9 }
  0x2b   : > { %p1060_p4 = por %p1059_p1, %p1058_p0 }
  0x2d   : > { %p1061_p3 = pnand %p1060_p4, %p1054_p13 }
  0x2f   : > { %1064 = shalt.err (!%p1061_p3)
}
  0x30   : > { %s1751_s28 = smov 128   ;;  %s1752_s10 = smov 8  }
  0x31   : > { %890 = dma.hbm_to_vmem [thread:$0]  (!%p1426_p9), %s224_s4, 1024, %s226_s2, %s1430_s14, %s1751_s28, %s1751_s28, %s1752_s10  }
  0x32   : > { %s1441_s12 = sadd.s32 4294967295, %s1271_s6   ;;  %s747_s13 = sadd.s32 4294967294, %s1271_s6  }
  0x33   : > { %p54_p7 = scmp.ne.s32.totalorder %s1247_s25, %s1243_s24  ;;  %p1754_p10 = scmp.eq.s32.totalorder %s1441_s12, 0 }
  0x34   : > { %s109_s8 = sadd.s32 1, %s1239_s23  ;;  %p116_p9 = scmp.ne.s32.totalorder %s1239_s23, %s1235_s22 }
  0x35   : > { %s1451_s15 = scalar_select %p107_p5, %s1239_s23, %s109_s8  }
  0x36   : > { %p1455_p11 = por %p1754_p10, %p54_p7  ;;  %p122_p12 = scmp.ne.s32.totalorder %s1235_s22, %s1231_s21 }
  0x37   : > { %s163_s4 = sadd.s32 1, %s1227_s20  ;;  %p1466_p13 = por %p116_p9, %p49_p2 }
  0x38   : > { %p173_p0 = scmp.ne.s32.totalorder %s1227_s20, %s1223_s19  ;;  %p1474_p5 = por %p122_p12, %p1754_p10 }
  0x39   : > { %p174_p1 = scmp.eq.s32.totalorder %s1441_s12, 3  ;;  %p179_p2 = scmp.ne.s32.totalorder %s1223_s19, %s1219_s18 }
  0x3a   : > { %s1776_s24 = scalar_select %p1474_p5, 1, 0 }
  0x3b   : > { %s1482_s11 = scalar_select %p1411_p8, %s1227_s20, %s163_s4  }
  0x3c   : > { %p1484_p4 = por %p174_p1, %p173_p0  ;;  %p180_p3 = scmp.eq.s32.totalorder %s747_s13, 3 }
  0x3d   : > { %p748_p7 = scmp.ge.s32.totalorder %s1271_s6, 1  ;;  %p187_p9 = scmp.lt.s32.totalorder %s1271_s6, 5 }
  0x3e   : > { %s1777_s21 = scalar_select %p1484_p4, 1, 0 }
  0x3f   : > { %p1492_p6 = por %p180_p3, %p179_p2  ;;  %p1496_p12 = pnand %p748_p7, %p187_p9 }
  0x40   : > { %s1276_s16 = smov [#allocation6]   ;;  %p1780_p8 = scmp.lt.s32.totalorder %s1271_s6, 4 }
  0x41   : > { %s1778_s9 = scalar_select %p1492_p6, 1, 0 }
  0x42   : > { %s203_s5 = sshll.u32 %s1276_s16, 4  ;;  %p1504_p0 = pnand %p1780_p8, %p1466_p13  ;;  %s204_s5 = int_to_ptr.vmem [resolvable:$true] %s203_s5 }
  0x43   : > { %p883_p1 = pneg %p1496_p12  ;;  %s237_s13 = sand.u32 1, %s1239_s23  }
  0x44   : > { %s754_s8 = sshll.u32 %s237_s13, 7  ;;  %s755_s28 = sshll.u32 %s1263_s29, 7 }
  0x45   : > { %p1513_p2 = pnand %p883_p1, %p1754_p10  ;;  %s239_s10 = scalar_lea.vmem [#allocation8], %s754_s8 }
  0x46   : > { %s245_s16 = sshll.u32 %s239_s10, 4  ;;  %s1521_s30 = scalar_lea.hbm %s1743_s3, %s755_s28  ;;  %s246_s16 = int_to_ptr.vmem [resolvable:$true] %s245_s16 }
  0x47   : > { %p1067_p13 = pneg %p1513_p2  ;;  %s1076_s7 = scalar_lea.vmem %s204_s5, 16 }
  0x48   : > { %p1077_p3 = scmp.ne.s32.totalorder %s204_s5, %s1076_s7  ;;  %s1083_s13 = scalar_lea.vmem %s204_s5, 32 }
  0x49   : > { %p1084_p8 = scmp.lt.s32.totalorder %s204_s5, %s204_s5  ;;  %p1085_p1 = scmp.lt.s32.totalorder %s1083_s13, %s1076_s7 }
  0x4a   : > { %p1079_p7 = pnand %p1077_p3, %p1067_p13 }
  0x4b   : > { %p1086_p10 = por %p1085_p1, %p1084_p8 }
  0x4c   : > { %p1080_p9 = pneg %p1079_p7 }
  0x4e   : > { %p1087_p6 = pnand %p1086_p10, %p1080_p9 }
  0x50   : > { %1090 = shalt.err (!%p1087_p6)
}
  0x51   : > { %s1783_s29 = sld [smem:[#allocation23_spill]]  ;;  %p1093_p4 = pneg %p1504_p0 }
  0x52   : > { %s1104_s0 = scalar_lea.vmem %s246_s16, 2048  ;;  %s1277_s28 = smov [#allocation8]  }
  0x53   : > { %p1105_p5 = scmp.ne.s32.totalorder %s246_s16, %s1104_s0  ;;  %s1109_s17 = sshll.u32 %s1277_s28, 4  ;;  %s1110_s17 = int_to_ptr.vmem [resolvable:$false] %s1109_s17 }
  0x54   : > { %s1111_s7 = scalar_lea.vmem %s1110_s17, 4096  ;;  %p1112_p10 = scmp.lt.s32.totalorder %s246_s16, %s1110_s17 }
  0x55   : > { %p1107_p13 = pnand %p1105_p5, %p1093_p4  ;;  %p1113_p6 = scmp.lt.s32.totalorder %s1111_s7, %s1104_s0 }
  0x57   : > { %886 = dma.hbm_to_vmem [thread:$0]  (!%p1513_p2), %s1783_s29, 16, %s204_s5, [#allocation7]  }
  0x58   : > { %p1108_p3 = pneg %p1107_p13  ;;  %p1114_p7 = por %p1113_p6, %p1112_p10 }
  0x5a   : > { %p1115_p9 = pnand %p1114_p7, %p1108_p3 }
  0x5c   : > { %1118 = shalt.err (!%p1115_p9)
}
  0x5d   : > { %s1278_s4 = smov 256   ;;  %s1784_s29 = smov 8  }
  0x5e   : > { %s1785_s5 = smov 128   ;;  %263 = sbr.rel (%p1496_p12) target bundleno = 695 (0x2b7), region = 40 }
  0x5f   : > { %893 = dma.hbm_to_vmem [thread:$0]  (!%p1504_p0), %s1521_s30, 2048, %s246_s16, %s1430_s14, %s1278_s4, %s1785_s5, %s1784_s29  }
  0x60   : > { %s265_s13 = sand.u32 (!%p1496_p12), 1, %s1441_s12   ;;  %s267_s10 = sand.u32 (!%p1496_p12), 1, %s1247_s25  }
  0x61   : > { %s757_s8 = sshll.u32 (!%p1496_p12), %s267_s10, 6  ;;  %s266_s0 = scalar_lea.sflag (!%p1496_p12), [#allocation4], %s265_s13 }
  0x62   : > { %s1542_s28 = scalar_lea.vmem (!%p1496_p12), [#allocation3], %s757_s8 }
  0x63   : > { %1202 = dma.done.wait (%p1455_p11), %s266_s0, 1024  }
  0x64   : > { %1204 = vsyncadd (%p1455_p11), %s266_s0, 4294966272  ;;  %p1786_p5 = scmp.eq.s32.totalorder %s1441_s12, 0 }
  0x66   : > { %1206 = dma.done.wait (%p1786_p5), [#allocation7], 16   ;;  %p1787_p4 = pmov %p1786_p5 }
  0x67   : > { %s280_s30 = sand.u32 1, %s1235_s22   ;;  %p1788_p12 = scmp.ne.s32.totalorder %s1776_s24, 0 }
  0x68   : > { %1208 = vsyncadd (%p1787_p4), [#allocation7], 4294967280  ;;  %s759_s14 = sshll.u32 %s280_s30, 7 }
  0x69   : > { %s1553_s1 = scalar_lea.vmem [#allocation8], %s759_s14 }
  0x6a   : > { %1210 = dma.done.wait (%p1788_p12), %s266_s0, 2048  }
  0x6b   : > { %1212 = vsyncadd (%p1788_p12), %s266_s0, 4294965248  ;;  %s1789_s2 = sld [smem:[#allocation14_spill]]  ;;  %s314_s27 = sand.u32 1, %s1223_s19  }
  0x6c   : > { %s760_s12 = sshll.u32 %s314_s27, 6  ;;  %s1790_s4 = sld [smem:[#allocation24_spill]] }
  0x6d   : > { %s1570_s5 = scalar_lea.vmem [#allocation9], %s760_s12 }
  0x71   : > { %p318_p11 = scmp.lt.s32.totalorder %s1789_s2, 1  ;;  %p761_p0 = scmp.ne.s32.totalorder %s1789_s2, 0 }
  0x72   : > { %s1791_s10 = sld [smem:[#allocation22_spill]] (!%p761_p0) }
  0x73   : > { %s1564_s16 = scalar_select %p318_p11, %s1789_s2, 1 }
  0x74   : > { %325 = sbr.rel (%p761_p0) target bundleno = 445 (0x1bd), region = 56 }
  0x75   : > { %s320_s29 = scalar_lea.vmem %s1790_s4, %s1564_s16 }
  0x79   : > { %v326_v0 = vld [vmem:[%s1542_s28] sm:$0xff]  ;;  %v328_v1 = vld [vmem:[%s1542_s28 + $0x10] sm:$0xff]  ;;  %v327_v2 = vld [vmem:[%s1542_s28 + $0x8] sm:$0xff] }
  0x7a   : > { %334 = vadd.xlane.f32.xlu0 %v326_v0  ;;  %338 = vadd.xlane.f32.xlu1 %v328_v1  ;;  %v329_v3 = vld [vmem:[%s1542_s28 + $0x18] sm:$0xff]  ;;  %v330_v4 = vld [vmem:[%s1542_s28 + $0x20] sm:$0xff]  ;;  %v331_v5 = vld [vmem:[%s1542_s28 + $0x28] sm:$0xff] }
  0x7b   : > { %v332_v6 = vld [vmem:[%s1542_s28 + $0x30] sm:$0xff]  ;;  %v333_v7 = vld [vmem:[%s1542_s28 + $0x38] sm:$0xff] }
  0x7e   : > { %336 = vadd.xlane.f32.xlu0 %v327_v2  ;;  %340 = vadd.xlane.f32.xlu1 %v329_v3 }
  0x82   : > { %342 = vadd.xlane.f32.xlu0 %v330_v4  ;;  %344 = vadd.xlane.f32.xlu1 %v331_v5 }
  0x86   : > { %346 = vadd.xlane.f32.xlu0 %v332_v6  ;;  %348 = vadd.xlane.f32.xlu1 %v333_v7 }
 0x103   : > { %v335_v8 = vpop.xlane.xlu0 %334  ;;  %v339_v9 = vpop.xlane.xlu1 %338 }
 0x104   : > { %v351_v10 = vmul.f32 0.0078125, %v335_v8  ;;  %v353_v11 = vmul.f32 0.0078125, %v339_v9 }
 0x106   : > { %v1581_v12 = vsub.f32 %v326_v0, %v351_v10  ;;  %v1583_v13 = vsub.f32 %v328_v1, %v353_v11  ;;  %v762_v0 = vld [vmem:[%s1791_s10] ss:$0 sm:$0xff] }
 0x107   : > { %v337_v14 = vpop.xlane.xlu0 %336  ;;  %v341_v15 = vpop.xlane.xlu1 %340 }
 0x108   : > { %v352_v16 = vmul.f32 0.0078125, %v337_v14  ;;  %v367_v17 = vmul.f32 %v1581_v12, %v1581_v12  ;;  %v354_v18 = vmul.f32 0.0078125, %v341_v15  ;;  %v369_v21 = vmul.f32 %v1583_v13, %v1583_v13 }
 0x10a   : > { %v1587_v19 = vsub.f32 %v327_v2, %v352_v16  ;;  %375 = vadd.xlane.f32.xlu0 %v367_v17  ;;  %v1589_v20 = vsub.f32 %v329_v3, %v354_v18  ;;  %v763_v3 = vld [vmem:[#allocation6] ss:$0 sm:$0xff] }
 0x10b   : > { %v343_v22 = vpop.xlane.xlu0 %342  ;;  %v345_v23 = vpop.xlane.xlu1 %344 }
 0x10c   : > { %v355_v24 = vmul.f32 0.0078125, %v343_v22  ;;  %v368_v25 = vmul.f32 %v1587_v19, %v1587_v19  ;;  %v356_v26 = vmul.f32 0.0078125, %v345_v23  ;;  %v370_v29 = vmul.f32 %v1589_v20, %v1589_v20 }
 0x10e   : > { %v1595_v27 = vsub.f32 %v330_v4, %v355_v24  ;;  %379 = vadd.xlane.f32.xlu0 %v369_v21  ;;  %377 = vadd.xlane.f32.xlu1 %v368_v25  ;;  %v1597_v28 = vsub.f32 %v331_v5, %v356_v26 }
 0x10f   : > { %v347_v30 = vpop.xlane.xlu0 %346  ;;  %v349_v31 = vpop.xlane.xlu1 %348 }
 0x110   : > { %v357_v32 = vmul.f32 0.0078125, %v347_v30  ;;  %v371_v33 = vmul.f32 %v1595_v27, %v1595_v27  ;;  %v358_v34 = vmul.f32 0.0078125, %v349_v31  ;;  %v372_v37 = vmul.f32 %v1597_v28, %v1597_v28 }
 0x112   : > { %v1603_v35 = vsub.f32 %v332_v6, %v357_v32  ;;  %381 = vadd.xlane.f32.xlu1 %v370_v29  ;;  %383 = vadd.xlane.f32.xlu0 %v371_v33  ;;  %v1605_v36 = vsub.f32 %v333_v7, %v358_v34 }
 0x114   : > { %v373_v38 = vmul.f32 %v1603_v35, %v1603_v35  ;;  %v374_v39 = vmul.f32 %v1605_v36, %v1605_v36 }
 0x116   : > { %385 = vadd.xlane.f32.xlu1 %v372_v37  ;;  %387 = vadd.xlane.f32.xlu0 %v373_v38 }
 0x11a   : > { %389 = vadd.xlane.f32.xlu1 %v374_v39 }
 0x193   : > { %v376_v40 = vpop.xlane.xlu0 %375 }
 0x194   : > { %v391_v41 = vmul.f32 0.0078125, %v376_v40 }
 0x196   : > { %v399_v42 = vadd.f32 1e-05, %v391_v41 }
 0x197   : > { %v378_v43 = vpop.xlane.xlu1 %377  ;;  %v380_v44 = vpop.xlane.xlu0 %379 }
 0x198   : > { %1021 = vrsqrt.f32 %v399_v42  ;;  %v392_v45 = vmul.f32 0.0078125, %v378_v43  ;;  %v393_v46 = vmul.f32 0.0078125, %v380_v44 }
 0x19a   : > { %v400_v47 = vadd.f32 1e-05, %v392_v45  ;;  %v401_v48 = vadd.f32 1e-05, %v393_v46 }
 0x19b   : > { %v382_v49 = vpop.xlane.xlu1 %381  ;;  %v384_v50 = vpop.xlane.xlu0 %383 }
 0x19c   : > { %1023 = vrsqrt.f32 %v400_v47  ;;  %v394_v51 = vmul.f32 0.0078125, %v382_v49  ;;  %v395_v52 = vmul.f32 0.0078125, %v384_v50 }
 0x19d   : > { %1025 = vrsqrt.f32 %v401_v48 }
 0x19e   : > { %v402_v53 = vadd.f32 1e-05, %v394_v51  ;;  %v403_v54 = vadd.f32 1e-05, %v395_v52 }
 0x19f   : > { %v386_v55 = vpop.xlane.xlu1 %385  ;;  %v388_v56 = vpop.xlane.xlu0 %387 }
 0x1a0   : > { %1027 = vrsqrt.f32 %v402_v53  ;;  %v396_v57 = vmul.f32 0.0078125, %v386_v55  ;;  %v397_v58 = vmul.f32 0.0078125, %v388_v56 }
 0x1a1   : > { %1029 = vrsqrt.f32 %v403_v54 }
 0x1a2   : > { %v404_v59 = vadd.f32 1e-05, %v396_v57  ;;  %v405_v60 = vadd.f32 1e-05, %v397_v58 }
 0x1a3   : > { %v390_v61 = vpop.xlane.xlu1 %389 }
 0x1a4   : > { %1031 = vrsqrt.f32 %v404_v59  ;;  %v398_v62 = vmul.f32 0.0078125, %v390_v61 }
 0x1a5   : > { %v1022_v63 = vpop.eup %1021  ;;  %1033 = vrsqrt.f32 %v405_v60 }
 0x1a6   : > { %v415_v1 = vmul.f32 %v1022_v63, %v1581_v12  ;;  %v406_v2 = vadd.f32 1e-05, %v398_v62 }
 0x1a8   : > { %v430_v4 = vmul.f32 %v762_v0, %v415_v1  ;;  %1035 = vrsqrt.f32 %v406_v2 }
 0x1a9   : > { %v1024_v5 = vpop.eup %1023 }
 0x1aa   : > { %v1026_v6 = vpop.eup %1025  ;;  %v445_v7 = vadd.f32 %v763_v3, %v430_v4  ;;  %v416_v8 = vmul.f32 %v1024_v5, %v1587_v19 }
 0x1ab   : > { %v417_v9 = vmul.f32 %v1026_v6, %v1583_v13 }
 0x1ac   : > { %453 = vst [vmem:[#allocation2 + $0x30] sm:$0xff] %v445_v7  ;;  %v431_v10 = vmul.f32 %v762_v0, %v416_v8 }
 0x1ad   : > { %v1028_v11 = vpop.eup %1027  ;;  %v432_v14 = vmul.f32 %v762_v0, %v417_v9 }
 0x1ae   : > { %v1030_v15 = vpop.eup %1029  ;;  %v446_v16 = vadd.f32 %v763_v3, %v431_v10  ;;  %v418_v17 = vmul.f32 %v1028_v11, %v1589_v20 }
 0x1af   : > { %v447_v12 = vadd.f32 %v763_v3, %v432_v14  ;;  %v419_v18 = vmul.f32 %v1030_v15, %v1595_v27 }
 0x1b0   : > { %454 = vst [vmem:[#allocation2] sm:$0xff] %v446_v16  ;;  %v433_v21 = vmul.f32 %v762_v0, %v418_v17 }
 0x1b1   : > { %v1032_v22 = vpop.eup %1031  ;;  %455 = vst [vmem:[#allocation2 + $0x18] sm:$0xff] %v447_v12  ;;  %v434_v23 = vmul.f32 %v762_v0, %v419_v18 }
 0x1b2   : > { %v1034_v24 = vpop.eup %1033  ;;  %v448_v19 = vadd.f32 %v763_v3, %v433_v21  ;;  %v420_v13 = vmul.f32 %v1032_v22, %v1597_v28 }
 0x1b3   : > { %v449_v25 = vadd.f32 %v763_v3, %v434_v23  ;;  %v421_v26 = vmul.f32 %v1034_v24, %v1603_v35 }
 0x1b4   : > { %456 = vst [vmem:[#allocation2 + $0x10] sm:$0xff] %v448_v19  ;;  %v435_v29 = vmul.f32 %v762_v0, %v420_v13 }
 0x1b5   : > { %v1036_v30 = vpop.eup %1035  ;;  %457 = vst [vmem:[#allocation2 + $0x8] sm:$0xff] %v449_v25  ;;  %v436_v20 = vmul.f32 %v762_v0, %v421_v26 }
 0x1b6   : > { %v450_v31 = vadd.f32 %v763_v3, %v435_v29  ;;  %v422_v27 = vmul.f32 %v1036_v30, %v1605_v36 }
 0x1b7   : > { %v451_v32 = vadd.f32 %v763_v3, %v436_v20 }
 0x1b8   : > { %458 = vst [vmem:[#allocation2 + $0x20] sm:$0xff] %v450_v31  ;;  %v437_v33 = vmul.f32 %v762_v0, %v422_v27 }
 0x1b9   : > { %459 = vst [vmem:[#allocation2 + $0x28] sm:$0xff] %v451_v32 }
 0x1ba   : > { %v452_v34 = vadd.f32 %v763_v3, %v437_v33 }
 0x1bc   : > { %460 = vst [vmem:[#allocation2 + $0x38] sm:$0xff] %v452_v34 }
 0x1bd PF: > { %v484_v28 = vld [vmem:[%s1553_s1 + $0x78] sm:$0xff]  ;;  %v483_v35 = vld [vmem:[%s1553_s1 + $0x70] sm:$0xff]  ;;  %v482_v36 = vld [vmem:[%s1553_s1 + $0x68] sm:$0xff]  ;;  %s1792_s8 = sld [smem:[#allocation15_spill]]  ;;  %s621_s17 = sshll.u32 %s1570_s5, 4  ;;  %s1657_s17 = int_to_ptr.vmem [resolvable:$true] %s621_s17 }
 0x1be   : > { %797 = vmatprep.subr.mxu0 %v484_v28  ;;  %841 = vmatprep.subr.mxu1 %v484_v28  ;;  %v481_v37 = vld [vmem:[%s1553_s1 + $0x60] sm:$0xff]  ;;  %v480_v38 = vld [vmem:[%s1553_s1 + $0x58] sm:$0xff]  ;;  %v479_v39 = vld [vmem:[%s1553_s1 + $0x50] sm:$0xff]  ;;  %s1793_s0 = sld [smem:[#allocation14_spill]]  ;;  %s1665_s24 = scalar_lea.sflag [#allocation5], %s314_s27 }
 0x1bf   : > { %798 = vmatpush3.msra.mxu0 %v484_v28  ;;  %857 = vmatpush3.msra.mxu1 %v484_v28  ;;  %v478_v40 = vld [vmem:[%s1553_s1 + $0x48] sm:$0xff]  ;;  %v477_v41 = vld [vmem:[%s1553_s1 + $0x40] sm:$0xff]  ;;  %v476_v42 = vld [vmem:[%s1553_s1 + $0x38] sm:$0xff]  ;;  %s1795_s4 = sld [smem:[#allocation25_spill]]  ;;  %s1119_s13 = scalar_lea.vmem %s1657_s17, 1024 }
 0x1c0   : > { %799 = vmatprep.subr.mxu0 %v483_v35  ;;  %842 = vmatprep.subr.mxu1 %v483_v35  ;;  %v475_v43 = vld [vmem:[%s1553_s1 + $0x30] sm:$0xff]  ;;  %v474_v44 = vld [vmem:[%s1553_s1 + $0x28] sm:$0xff]  ;;  %v473_v45 = vld [vmem:[%s1553_s1 + $0x20] sm:$0xff]  ;;  %p1120_p2 = scmp.ne.s32.totalorder %s1657_s17, %s1119_s13  ;;  %p1796_p8 = scmp.ne.s32.totalorder %s1777_s21, 0 }
 0x1c1   : > { %800 = vmatpush3.msra.mxu0 %v483_v35  ;;  %858 = vmatpush3.msra.mxu1 %v483_v35  ;;  %v472_v46 = vld [vmem:[%s1553_s1 + $0x18] sm:$0xff]  ;;  %v471_v47 = vld [vmem:[%s1553_s1 + $0x10] sm:$0xff]  ;;  %v470_v48 = vld [vmem:[%s1553_s1 + $0x8] sm:$0xff]  ;;  %s1279_s10 = smov [#allocation9]  }
 0x1c2   : > { %801 = vmatprep.subr.mxu0 %v482_v36  ;;  %843 = vmatprep.subr.mxu1 %v482_v36  ;;  %v469_v49 = vld [vmem:[%s1553_s1] sm:$0xff]  ;;  %v461_v50 = vld [vmem:[#allocation2 + $0x30] sm:$0xff]  ;;  %v463_v54 = vld [vmem:[#allocation2 + $0x18] sm:$0xff]  ;;  %p1121_p1 = pnand %p1120_p2, %p1796_p8 }
 0x1c3   : > { %802 = vmatpush3.msra.mxu0 %v482_v36  ;;  %859 = vmatpush3.msra.mxu1 %v482_v36  ;;  %v465_v51 = vld [vmem:[#allocation2 + $0x8] sm:$0xff]  ;;  %v462_v52 = vld [vmem:[#allocation2] sm:$0xff]  ;;  %v464_v56 = vld [vmem:[#allocation2 + $0x10] sm:$0xff]  ;;  %s772_s28 = sshll.u32 %s1792_s8, 4  ;;  %s1123_s8 = sshll.u32 %s1279_s10, 4  ;;  %s1124_s8 = int_to_ptr.vmem [resolvable:$false] %s1123_s8 }
 0x1c4   : > { %803 = vmatprep.subr.mxu0 %v481_v37  ;;  %844 = vmatprep.subr.mxu1 %v481_v37  ;;  %v466_v53 = vld [vmem:[#allocation2 + $0x20] sm:$0xff]  ;;  %v467_v55 = vld [vmem:[#allocation2 + $0x28] sm:$0xff]  ;;  %v468_v57 = vld [vmem:[#allocation2 + $0x38] sm:$0xff]  ;;  %s618_s2 = sadd.s32 %s1793_s0, %s772_s28  ;;  %p1122_p13 = pneg %p1121_p1 }
 0x1c5   : > { %804 = vmatpush3.msra.mxu0 %v481_v37  ;;  %860 = vmatpush3.msra.mxu1 %v481_v37  ;;  %v764_v58 = vld [vmem:[%s320_s29] ss:$0 sm:$0xff]  ;;  %s768_s12 = sshll.u32 %s618_s2, 7  ;;  %s1125_s0 = scalar_lea.vmem %s1124_s8, 2048 }
 0x1c6   : > { %805 = vmatprep.subr.mxu0 %v480_v38  ;;  %845 = vmatprep.subr.mxu1 %v480_v38  ;;  %s1655_s29 = scalar_lea.hbm %s1795_s4, %s768_s12  ;;  %p1126_p3 = scmp.lt.s32.totalorder %s1657_s17, %s1124_s8 }
 0x1c7   : > { %806 = vmatpush3.msra.mxu0 %v480_v38  ;;  %861 = vmatpush3.msra.mxu1 %v480_v38  ;;  %p1127_p10 = scmp.lt.s32.totalorder %s1125_s0, %s1119_s13 }
 0x1c8   : > { %807 = vmatprep.subr.mxu0 %v479_v39  ;;  %846 = vmatprep.subr.mxu1 %v479_v39 }
 0x1c9   : > { %808 = vmatpush3.msra.mxu0 %v479_v39  ;;  %862 = vmatpush3.msra.mxu1 %v479_v39  ;;  %p1128_p6 = por %p1127_p10, %p1126_p3 }
 0x1ca   : > { %809 = vmatprep.subr.mxu0 %v478_v40  ;;  %847 = vmatprep.subr.mxu1 %v478_v40 }
 0x1cb   : > { %810 = vmatpush3.msra.mxu0 %v478_v40  ;;  %863 = vmatpush3.msra.mxu1 %v478_v40  ;;  %p1129_p7 = pnand %p1128_p6, %p1122_p13 }
 0x1cc   : > { %811 = vmatprep.subr.mxu0 %v477_v41  ;;  %848 = vmatprep.subr.mxu1 %v477_v41 }
 0x1cd   : > { %812 = vmatpush3.msra.mxu0 %v477_v41  ;;  %864 = vmatpush3.msra.mxu1 %v477_v41 }
 0x1ce   : > { %813 = vmatprep.subr.mxu0 %v476_v42  ;;  %849 = vmatprep.subr.mxu1 %v476_v42 }
 0x1cf   : > { %814 = vmatpush3.msra.mxu0 %v476_v42  ;;  %865 = vmatpush3.msra.mxu1 %v476_v42 }
 0x1d0   : > { %815 = vmatprep.subr.mxu0 %v475_v43  ;;  %850 = vmatprep.subr.mxu1 %v475_v43 }
 0x1d1   : > { %816 = vmatpush3.msra.mxu0 %v475_v43  ;;  %866 = vmatpush3.msra.mxu1 %v475_v43 }
 0x1d2   : > { %817 = vmatprep.subr.mxu0 %v474_v44  ;;  %851 = vmatprep.subr.mxu1 %v474_v44 }
 0x1d3   : > { %818 = vmatpush3.msra.mxu0 %v474_v44  ;;  %867 = vmatpush3.msra.mxu1 %v474_v44 }
 0x1d4   : > { %819 = vmatprep.subr.mxu0 %v473_v45  ;;  %852 = vmatprep.subr.mxu1 %v473_v45 }
 0x1d5   : > { %820 = vmatpush3.msra.mxu0 %v473_v45  ;;  %868 = vmatpush3.msra.mxu1 %v473_v45 }
 0x1d6   : > { %821 = vmatprep.subr.mxu0 %v472_v46  ;;  %853 = vmatprep.subr.mxu1 %v472_v46 }
 0x1d7   : > { %822 = vmatpush3.msra.mxu0 %v472_v46  ;;  %869 = vmatpush3.msra.mxu1 %v472_v46 }
 0x1d8   : > { %823 = vmatprep.subr.mxu0 %v471_v47  ;;  %854 = vmatprep.subr.mxu1 %v471_v47 }
 0x1d9   : > { %824 = vmatpush3.msra.mxu0 %v471_v47  ;;  %870 = vmatpush3.msra.mxu1 %v471_v47 }
 0x1da   : > { %825 = vmatprep.subr.mxu0 %v470_v48  ;;  %855 = vmatprep.subr.mxu1 %v470_v48 }
 0x1db   : > { %826 = vmatpush3.msra.mxu0 %v470_v48  ;;  %871 = vmatpush3.msra.mxu1 %v470_v48 }
 0x1dc   : > { %827 = vmatprep.subr.mxu0 %v469_v49  ;;  %856 = vmatprep.subr.mxu1 %v469_v49 }
 0x1dd   : > { %828 = vmatpush3.msra.mxu0 %v469_v49  ;;  %872 = vmatpush3.msra.mxu1 %v469_v49 }
 0x1de   : > { %829 = vmatprep.mubr.f32.mxu0 %v461_v50  ;;  %835 = vmatprep.mubr.f32.mxu1 %v465_v51 }
 0x1df   : > { %830 = vmatmul.mubr.f32.vlgmr.msra.gmra.mxu0 %v462_v52  ;;  %836 = vmatmul.mubr.f32.vlgmr.msra.gmra.mxu1 %v466_v53 }
 0x1e0   : > { %832 = vmatprep.mubr.f32.mxu0 %v463_v54  ;;  %838 = vmatprep.mubr.f32.mxu1 %v467_v55 }
 0x1e3   : > { %833 = vmatmul.mubr.f32.gmra.mxu0 %v464_v56  ;;  %839 = vmatmul.mubr.f32.gmra.mxu1 %v468_v57 }
 0x29f   : > { %v831_v59 = vpop.f32.mrf.mxu0  ;;  %v837_v60 = vpop.f32.mrf.mxu1 }
 0x2a0   : > { %v564_v61 = vadd.f32 %v831_v59, %v764_v58  ;;  %v584_v62 = vadd.f32 %v837_v60, %v764_v58 }
 0x2a1   : > { %v558_v63 = vpop.f32.mrf.mxu0  ;;  %v578_v0 = vpop.f32.mrf.mxu1 }
 0x2a2   : > { %598 = vst [vmem:[%s1570_s5 + $0x8] sm:$0xff] %v564_v61  ;;  %602 = vst [vmem:[%s1570_s5 + $0x28] sm:$0xff] %v584_v62  ;;  %v559_v1 = vadd.f32 %v764_v58, %v558_v63  ;;  %v579_v2 = vadd.f32 %v764_v58, %v578_v0 }
 0x2a3   : > { %v834_v3 = vpop.f32.mrf.mxu0  ;;  %v840_v4 = vpop.f32.mrf.mxu1 }
 0x2a4   : > { %597 = vst [vmem:[%s1570_s5] sm:$0xff] %v559_v1  ;;  %601 = vst [vmem:[%s1570_s5 + $0x20] sm:$0xff] %v579_v2  ;;  %v574_v5 = vadd.f32 %v834_v3, %v764_v58  ;;  %v594_v6 = vadd.f32 %v840_v4, %v764_v58 }
 0x2a5   : > { %v568_v7 = vpop.f32.mrf.mxu0  ;;  %v588_v8 = vpop.f32.mrf.mxu1 }
 0x2a6   : > { %600 = vst [vmem:[%s1570_s5 + $0x18] sm:$0xff] %v574_v5  ;;  %604 = vst [vmem:[%s1570_s5 + $0x38] sm:$0xff] %v594_v6  ;;  %v569_v9 = vadd.f32 %v764_v58, %v568_v7  ;;  %v589_v10 = vadd.f32 %v764_v58, %v588_v8 }
 0x2a8   : > { %599 = vst [vmem:[%s1570_s5 + $0x10] sm:$0xff] %v569_v9  ;;  %603 = vst [vmem:[%s1570_s5 + $0x30] sm:$0xff] %v589_v10 }
 0x2a9   : > { %1132 = shalt.err (!%p1129_p7)
}
 0x2aa   : > { %s1133_s27 = scalar_lea.hbm %s1655_s29, 1024  ;;  %s1137_s30 = scalar_lea.hbm %s1795_s4, 4096 }
 0x2ab   : > { %p1134_p9 = scmp.ne.s32.totalorder %s1655_s29, %s1133_s27  ;;  %p1138_p12 = scmp.lt.s32.totalorder %s1655_s29, %s1795_s4 }
 0x2ac   : > { %p1139_p11 = scmp.lt.s32.totalorder %s1137_s30, %s1133_s27 }
 0x2ad   : > { %p1135_p5 = pnand %p1134_p9, %p1796_p8 }
 0x2ae   : > { %p1140_p0 = por %p1139_p11, %p1138_p12 }
 0x2af   : > { %p1136_p4 = pneg %p1135_p5 }
 0x2b1   : > { %p1141_p2 = pnand %p1140_p0, %p1136_p4 }
 0x2b3   : > { %1144 = shalt.err (!%p1141_p2)
}
 0x2b4   : > { %s1280_s2 = smov 128   ;;  %s1281_s12 = smov 256  }
 0x2b5   : > { %s1282_s16 = smov 8  }
 0x2b6   : > { %881 = dma.vmem_to_hbm [thread:$0]  (%p1796_p8), %s1657_s17, 1024, %s1655_s29, %s1665_s24, %s1280_s2, %s1281_s12, %s1282_s16  }
 0x2b7 PF: > { %p901_p1 = scmp.ge.s32.totalorder %s1271_s6, 2  ;;  %s636_s7 = sand.u32 1, %s1219_s18  }
 0x2b8   : > { %p1797_p13 = scmp.ne.s32.totalorder %s1778_s9, 0  ;;  %s637_s13 = scalar_lea.sflag [#allocation5], %s636_s7 }
 0x2ba   : > { %p895_p3 = pnand %p901_p1, %p1797_p13 }
 0x2bc   : > { %p896_p10 = pneg %p895_p3 }
 0x2be   : > { %1214 = dma.done.wait (%p896_p10), %s637_s13, 1024  }
 0x2bf   : > { %1216 = vsyncadd (%p896_p10), %s637_s13, 4294966272  ;;  %s22_s6 = sadd.s32 1, %s1271_s6   ;;  %s1799_s9 = sld [smem:[#allocation20_spill]] }
 0x2c0   : > { %p1693_p6 = scmp.ge.s32.totalorder %s22_s6, 6   ;;  %s1800_s27 = sld [smem:[#allocation16_spill]] }
 0x2c1   : > { %s1801_s28 = sld [smem:[#allocation17_spill]]  ;;  %s1804_s18 = smov %s1223_s19 }
 0x2c2   : > { %s1802_s29 = sld [smem:[#allocation18_spill]]  ;;  %s1805_s19 = smov %s1227_s20 }
 0x2c3   : > { %s1803_s30 = sld [smem:[#allocation19_spill]]  ;;  %s1806_s20 = smov %s1482_s11 }
 0x2c4   : > { %s1807_s21 = smov %s1235_s22  ;;  %s1808_s22 = smov %s1239_s23 }
 0x2c5   : > { %s1809_s23 = smov %s1451_s15  ;;  %s1810_s24 = smov %s1247_s25 }
 0x2c6   : > { %s1811_s25 = smov %s1251_s26  ;;  %s1812_s26 = smov %s1799_s9 }
 0x2c7   :  { %21 = sbr.rel (!%p1693_p6) target bundleno = 17 (0x11), region = 107 }
 0x2cc   :  { %642 = vsyncpa [#allocation4], 1 }
 0x2cd   :  { %644 = vsyncpa [#allocation4 + $0x1], 1 }
 0x2ce   :  { %645 = vsyncpa [#allocation7], 1 }
 0x2cf   :  { %646 = vsyncpa [#allocation5], 1 }
 0x2d0   :  { %648 = vsyncpa [#allocation5 + $0x1], 1 }

</bundles_post_ra>
